<compile_context>
chip_gen: v5e
topology: v5e:2x2
jax: 0.10.0
libtpu: 0.0.40
codegen_flags: <defaults>
</compile_context>

<pallas_src>
import numpy as np
import jax
import jax.numpy as jnp
from jax import lax
from jax.experimental import pallas as pl
from jax.experimental.pallas import tpu as pltpu

# ----------------------------- config -------------------------------------
VOCAB_SIZE = 8
HIDDEN_SIZE = 32
INPUT_SIZE = 32          # == HIDDEN_SIZE so concat(x1, x2) width == 2*HIDDEN_SIZE
CONV_CH = 64
B = 2
H_SP = 1                 # spectral "height" (kernels are (1, k) -> H untouched)
W_SP = 8
W_POOL = (W_SP + 2 - 3) // 2 + 1          # MaxPool2d((1,3), stride=(1,2), padding=(0,1)) -> 4
ION_SIZE = CONV_CH * H_SP * W_POOL        # 64 * 1 * 4 = 256

# Packed-slab row offsets (all multiples of 8 -> sublane-aligned in-kernel row slices).
# 64-lane slab: [w1 im2col | b1 | w2 fused | b2 | pool-gather one-hot]
W1F_R, B1_R, W2F_R, B2_R, SEL_R = 0, 24, 32, 160, 168
# 128-lane slab: [wih ; whh | fused lstm bias]
WXH_R, BLSTM_R = 0, 64
# 32-lane slab: [wfc flat | bfc | wd (lane-padded) | bd]
WFC_R, BFC_R, WD_R, BD_R = 0, 256, 264, 328


# ----------------------------- fused kernel --------------------------------
def decoder_kernel(frag_ref, state_ref, w64_ref, w128_ref, w32_ref, out_ref):
    f32 = jnp.float32
    BW = frag_ref.shape[0]            # padded_batch * W_SP token rows
    BP = BW // W_SP                   # padded batch
    H = HIDDEN_SIZE
    V = VOCAB_SIZE

    def mm(a, b):
        # TODO(synk): bf16 operand cast here for v6e/v7x (keep f32 accumulation).
        return jnp.dot(a, b, preferred_element_type=f32)

    # Per-batch boundary masks for the +/-1 token shifts (w = row % W_SP).
    wpos = lax.broadcasted_iota(jnp.int32, (BW, 1), 0) % W_SP
    left_ok = jnp.where(wpos == 0, 0.0, 1.0).astype(f32)            # token w-1 exists
    right_ok = jnp.where(wpos == W_SP - 1, 0.0, 1.0).astype(f32)    # token w+1 exists

    # ---- Ion_CNN conv1: im2col assembled in wrapper -> ONE (BW,3V)@(3V,64) matmul + ReLU
    y1 = jnp.maximum(
        mm(frag_ref[...], w64_ref[W1F_R:W1F_R + 3 * V, :]) + w64_ref[B1_R:B1_R + 1, :],
        0.0)                                                        # (BW, 64)

    # ---- conv2 (1x2, torch 'same' pads right only): taps y1[w] and y1[w+1].
    # +1 shift on the XLU (roll) + boundary zero-mask, fused into one K=128 matmul.
    y1_p1 = pltpu.roll(y1, shift=BW - 1, axis=0) * right_ok
    y2 = jnp.maximum(
        mm(jnp.concatenate([y1, y1_p1], axis=-1),
           w64_ref[W2F_R:W2F_R + 2 * CONV_CH, :]) + w64_ref[B2_R:B2_R + 1, :],
        0.0)                                                        # (BW, 64)

    # ---- MaxPool2d((1,3), stride (1,2), padding (0,1)).
    # Zero-masked out-of-range neighbors == -inf padding because y2 >= 0 (post-ReLU).
    pm1 = pltpu.roll(y2, shift=1, axis=0) * left_ok                 # neighbor w-1
    pp1 = pltpu.roll(y2, shift=BW - 1, axis=0) * right_ok           # neighbor w+1
    pwin = jnp.maximum(jnp.maximum(pm1, y2), pp1)                   # (BW, 64)

    # Stride-2 pool-position gather via a PRECOMPUTED one-hot (rows p-major), then
    # lane-dense (BP, 256) assembly and ONE fc matmul (BP,256)@(256,32).
    sel = w64_ref[SEL_R:SEL_R + W_POOL * BP, :]                     # (W_POOL*BP, BW)
    prow = mm(sel, pwin)                                            # rows: p*BP + b
    pooled = jnp.concatenate(
        [prow[p * BP:(p + 1) * BP, :] for p in range(W_POOL)], axis=-1)   # (BP, 256)
    x1 = jnp.maximum(
        mm(pooled, w32_ref[WFC_R:WFC_R + ION_SIZE, :]) + w32_ref[BFC_R:BFC_R + 1, :],
        0.0)                                                        # (BP, 32)

    # ---- Seq_LSTM: [emb | h0] @ [wih ; whh] as ONE (BP,2H)@(2H,4H) matmul; gates (i,f,g,o)
    gates = (mm(state_ref[:, 0:2 * H], w128_ref[WXH_R:WXH_R + 2 * H, :])
             + w128_ref[BLSTM_R:BLSTM_R + 1, :])                    # (BP, 128)
    c0 = state_ref[:, 2 * H:3 * H]
    i_g = jax.nn.sigmoid(gates[:, 0 * H:1 * H])
    f_g = jax.nn.sigmoid(gates[:, 1 * H:2 * H])
    g_g = jnp.tanh(gates[:, 2 * H:3 * H])
    o_g = jax.nn.sigmoid(gates[:, 3 * H:4 * H])
    c1 = f_g * c0 + i_g * g_g
    h1 = o_g * jnp.tanh(c1)

    # ---- dense head: Linear(2H, V) on concat(x1, h1) + ReLU + LogSoftmax(dim=1)
    wd = w32_ref[WD_R:WD_R + 2 * H, 0:V]
    bd = w32_ref[BD_R:BD_R + 1, 0:V]
    y = jnp.maximum(mm(jnp.concatenate([x1, h1], axis=-1), wd) + bd, 0.0)
    s = y - jnp.max(y, axis=-1, keepdims=True)
    logit = s - jnp.log(jnp.sum(jnp.exp(s), axis=-1, keepdims=True))

    # ---- single lane-dense (BP, 128) output slab [h1 | c1 | logit | 0]:
    # one unmasked store, one writeback DMA (was 3 narrow masked stores / 2 DMAs).
    zpad = jnp.zeros((BP, 128 - 2 * H - V), f32)
    out_ref[...] = jnp.concatenate([h1, c1, logit, zpad], axis=-1)


# ----------------------------- wrapper --------------------------------------
def decoder_forward_pallas(packed, embedded, fragments, h0, c0):
    """Decoder.forward (eval mode) as a single fused Pallas call."""
    b = fragments.shape[0]
    bp = max(8, ((b + 7) // 8) * 8)    # pad batch to a full sublane group
    pad = bp - b
    assert packed["w64"].shape[0] == SEL_R + W_POOL * bp, "params packed for a different batch pad"

    # NCHW (b, V, 1, W) -> token rows; conv1 'same' im2col built once here (off the
    # recurrent critical path, fused by XLA) so conv1 is a single in-kernel matmul.
    x = jnp.transpose(fragments[:, :, 0, :], (0, 2, 1))              # (b, W, V)
    x = jnp.pad(x, ((0, pad), (0, 0), (0, 0)))                       # (bp, W, V)
    x_m1 = jnp.pad(x[:, :-1, :], ((0, 0), (1, 0), (0, 0)))           # token w-1 (zero at left)
    x_p1 = jnp.pad(x[:, 1:, :], ((0, 0), (0, 1), (0, 0)))            # token w+1 (zero at right)
    frag_i2c = jnp.concatenate([x_m1, x, x_p1], axis=-1).reshape(bp * W_SP, 3 * VOCAB_SIZE)

    # emb | h0 | c0 in one (bp, 3H) slab: one pad, one input DMA.
    state_in = jnp.pad(jnp.concatenate([embedded, h0, c0], axis=1), ((0, pad), (0, 0)))

    out = pl.pallas_call(
        decoder_kernel,
        out_shape=jax.ShapeDtypeStruct((bp, 128), jnp.float32),
    )(frag_i2c, state_in, packed["w64"], packed["w128"], packed["w32"])

    h1 = out[:b, 0:HIDDEN_SIZE]
    c1 = out[:b, HIDDEN_SIZE:2 * HIDDEN_SIZE]
    logit = out[:b, 2 * HIDDEN_SIZE:2 * HIDDEN_SIZE + VOCAB_SIZE]
    return logit, (h1, c1)


# ----------------------------- param packing --------------------------------
def _pad_rows(x, rows):
    return jnp.pad(x, ((0, rows - x.shape[0]), (0, 0)))


def pack_params(params, bp):
    """Pack all weights/biases into 3 lane-width-grouped slabs (done once, off-line)."""
    assert bp * W_SP == CONV_CH, "pool one-hot rides in the 64-lane slab (needs bp*W == 64)"

    # stride-2 pool-position gather, rows p-major: row p*bp + b selects pwin row b*W + 2p
    sel = np.zeros((W_POOL * bp, bp * W_SP), np.float32)
    for p in range(W_POOL):
        for bb in range(bp):
            sel[p * bp + bb, bb * W_SP + 2 * p] = 1.0

    w64 = jnp.concatenate([
        params["w1"].reshape(3 * VOCAB_SIZE, CONV_CH),   # rows   0: 24
        _pad_rows(params["b1"], 8),                      # rows  24: 32
        params["w2"].reshape(2 * CONV_CH, CONV_CH),      # rows  32:160
        _pad_rows(params["b2"], 8),                      # rows 160:168
        jnp.asarray(sel),                                # rows 168:168+W_POOL*bp
    ], axis=0)

    w128 = jnp.concatenate([
        params["wih"],                                   # rows  0:32
        params["whh"],                                   # rows 32:64
        _pad_rows(params["blstm"], 8),                   # rows 64:72
    ], axis=0)

    wd32 = jnp.pad(params["wd"], ((0, 0), (0, 32 - VOCAB_SIZE)))
    bd32 = jnp.pad(params["bd"], ((0, 0), (0, 32 - VOCAB_SIZE)))
    w32 = jnp.concatenate([
        params["wfc"].reshape(ION_SIZE, INPUT_SIZE),     # rows   0:256
        _pad_rows(params["bfc"], 8),                     # rows 256:264
        wd32,                                            # rows 264:328
        _pad_rows(bd32, 8),                              # rows 328:336
    ], axis=0)

    return {"w64": w64, "w128": w128, "w32": w32}


# ----------------------------- pure-JAX reference ---------------------------
def decoder_forward_ref(params, embedded, fragments, h0, c0):
    b, v, _, w = fragments.shape
    x = jnp.transpose(fragments[:, :, 0, :], (0, 2, 1))           # (b, w, v)

    # conv1 (1x3, 'same') + ReLU
    xp = jnp.pad(x, ((0, 0), (1, 1), (0, 0)))
    y1 = sum(jnp.einsum("bwv,vc->bwc", xp[:, d:d + w, :], params["w1"][d])
             for d in range(3)) + params["b1"]
    y1 = jnp.maximum(y1, 0.0)

    # conv2 (1x2, 'same': torch pads right only) + ReLU
    y1p = jnp.pad(y1, ((0, 0), (0, 1), (0, 0)))
    y2 = sum(jnp.einsum("bwc,cd->bwd", y1p[:, d:d + w, :], params["w2"][d])
             for d in range(2)) + params["b2"]
    y2 = jnp.maximum(y2, 0.0)

    # MaxPool2d((1,3), stride=(1,2), padding=(0,1)); zero pad == -inf post-ReLU
    y2p = jnp.pad(y2, ((0, 0), (1, 1), (0, 0)))
    pooled = jnp.stack([jnp.max(y2p[:, 2 * p:2 * p + 3, :], axis=1)
                        for p in range(W_POOL)], axis=1)          # (b, P, C)

    # fc (channel-major flatten via per-position slabs) + ReLU
    fc = sum(pooled[:, p, :] @ params["wfc"][p] for p in range(W_POOL))
    x1 = jnp.maximum(fc + params["bfc"], 0.0)

    # LSTMCell, fused gate matrices, PyTorch gate order (i, f, g, o)
    gates = embedded @ params["wih"] + h0 @ params["whh"] + params["blstm"]
    i_g, f_g, g_g, o_g = jnp.split(gates, 4, axis=1)
    c1 = jax.nn.sigmoid(f_g) * c0 + jax.nn.sigmoid(i_g) * jnp.tanh(g_g)
    h1 = jax.nn.sigmoid(o_g) * jnp.tanh(c1)

    # dense head
    xcat = jnp.concatenate([x1, h1], axis=1)
    y = jnp.maximum(xcat @ params["wd"] + params["bd"], 0.0)
    logit = jax.nn.log_softmax(y, axis=1)
    return logit, (h1, c1)


# ----------------------------- params ---------------------------------------
def _init_params(key):
    ks = jax.random.split(key, 11)
    s = 0.1
    f32 = jnp.float32
    return {
        # conv1 Conv2d(V, 64, (1,3)): per-tap (V, 64); tap d multiplies x[w + d - 1].
        # (real torch weights map as w1[d, cin, cout] = W[cout, cin, 0, d])
        "w1": s * jax.random.normal(ks[0], (3, VOCAB_SIZE, CONV_CH), f32),
        "b1": s * jax.random.normal(ks[1], (1, CONV_CH), f32),
        # conv2 Conv2d(64, 64, (1,2)): tap d multiplies y1[w + d] (torch 'same' pads right).
        "w2": s * jax.random.normal(ks[2], (2, CONV_CH, CONV_CH), f32),
        "b2": s * jax.random.normal(ks[3], (1, CONV_CH), f32),
        # fc Linear(ION_SIZE, INPUT): per-pool-position slabs; real torch weights map as
        # wfc[p, c, i] = W[i, c * W_POOL + p]  (matches NCHW .view(-1, ION_SIZE)).
        "wfc": s * jax.random.normal(ks[4], (W_POOL, CONV_CH, INPUT_SIZE), f32),
        "bfc": s * jax.random.normal(ks[5], (1, INPUT_SIZE), f32),
        # LSTMCell(INPUT, HIDDEN): fused gates along 4H lanes, order (i, f, g, o);
        # wih = weight_ih.T, whh = weight_hh.T, blstm = (bias_ih + bias_hh)[None, :].
        "wih": s * jax.random.normal(ks[6], (INPUT_SIZE, 4 * HIDDEN_SIZE), f32),
        "whh": s * jax.random.normal(ks[7], (HIDDEN_SIZE, 4 * HIDDEN_SIZE), f32),
        "blstm": s * jax.random.normal(ks[8], (1, 4 * HIDDEN_SIZE), f32),
        # dense head: Linear(2*HIDDEN, VOCAB)
        "wd": s * jax.random.normal(ks[9], (2 * HIDDEN_SIZE, VOCAB_SIZE), f32),
        "bd": s * jax.random.normal(ks[10], (1, VOCAB_SIZE), f32),
    }


# ----------------------------- main ------------------------------------------
if __name__ == "__main__":
    key = jax.random.PRNGKey(0)
    kp, kf, ke, kh, kc = jax.random.split(key, 5)

    params = _init_params(kp)
    fragments = jax.random.normal(kf, (B, VOCAB_SIZE, H_SP, W_SP), jnp.float32)  # NCHW
    embedded = jax.random.normal(ke, (B, INPUT_SIZE), jnp.float32)
    h0 = jax.random.normal(kh, (B, HIDDEN_SIZE), jnp.float32)
    c0 = jax.random.normal(kc, (B, HIDDEN_SIZE), jnp.float32)

    bp = max(8, ((B + 7) // 8) * 8)
    packed = pack_params(params, bp)            # done once, outside the hot path

    fwd = jax.jit(decoder_forward_pallas)
    logit, (h1, c1) = fwd(packed, embedded, fragments, h0, c0)
    jax.block_until_ready((logit, h1, c1))

    # pure-JAX reference (same math, no Pallas)
    ref_logit, (ref_h1, ref_c1) = decoder_forward_ref(params, embedded, fragments, h0, c0)

    assert logit.shape == (B, VOCAB_SIZE)
    assert h1.shape == (B, HIDDEN_SIZE) and c1.shape == (B, HIDDEN_SIZE)
    # tolerance covers MXU vs XLA accumulation-order differences (all math is f32)
    assert jnp.allclose(logit, ref_logit, atol=1e-4, rtol=1e-4)
    assert jnp.allclose(h1, ref_h1, atol=1e-4, rtol=1e-4)
    assert jnp.allclose(c1, ref_c1, atol=1e-4, rtol=1e-4)
    # log-softmax rows should exponentiate to 1
    assert jnp.allclose(jnp.exp(logit).sum(axis=1), jnp.ones((B,)), atol=1e-5)

    print("KERNEL_OK")
</pallas_src>

<mosaic_0001>
module attributes {stable_mosaic.version = 11 : i64} {
  func.func @decoder_kernel(%arg0: memref<64x24xf32, #tpu.memory_space<vmem>>, %arg1: memref<8x96xf32, #tpu.memory_space<vmem>>, %arg2: memref<200x64xf32, #tpu.memory_space<vmem>>, %arg3: memref<72x128xf32, #tpu.memory_space<vmem>>, %arg4: memref<336x32xf32, #tpu.memory_space<vmem>>, %arg5: memref<8x128xf32, #tpu.memory_space<vmem>>) attributes {dimension_semantics = [], scalar_prefetch = 0 : i64, scratch_operands = 0 : i64, tpu.core_type = #tpu.core_type<tc>} {
    %0 = tpu.iota {dimensions = array<i32: 0>} : vector<64x1xi32>
    %c8_i32 = arith.constant 8 : i32
    %c0_i32 = arith.constant 0 : i32
    %1 = arith.cmpi eq, %c8_i32, %c0_i32 : i32
    %c1_i32 = arith.constant 1 : i32
    %2 = arith.select %1, %c1_i32, %c8_i32 : i32
    %3 = vector.broadcast %2 : i32 to vector<64x1xi32>
    %4 = arith.remsi %0, %3 : vector<64x1xi32>
    %c0_i32_0 = arith.constant 0 : i32
    %5 = vector.broadcast %c0_i32_0 : i32 to vector<64x1xi32>
    %6 = arith.cmpi ne, %4, %5 : vector<64x1xi32>
    %c0_i32_1 = arith.constant 0 : i32
    %7 = vector.broadcast %c0_i32_1 : i32 to vector<64x1xi32>
    %8 = arith.cmpi slt, %4, %7 : vector<64x1xi32>
    %c0_i32_2 = arith.constant 0 : i32
    %9 = arith.cmpi slt, %2, %c0_i32_2 : i32
    %10 = vector.broadcast %9 : i1 to vector<64x1xi1>
    %11 = vector.broadcast %10 : vector<64x1xi1> to vector<64x1xi1>
    %12 = arith.xori %8, %11 : vector<64x1xi1>
    %13 = arith.andi %12, %6 : vector<64x1xi1>
    %14 = vector.broadcast %2 : i32 to vector<64x1xi32>
    %15 = arith.addi %4, %14 : vector<64x1xi32>
    %16 = arith.select %13, %15, %4 : vector<64x1xi1>, vector<64x1xi32>
    %c0_i32_3 = arith.constant 0 : i32
    %17 = vector.broadcast %c0_i32_3 : i32 to vector<64x1xi32>
    %18 = arith.cmpi eq, %16, %17 : vector<64x1xi32>
    %cst = arith.constant 0.000000e+00 : f32
    %cst_4 = arith.constant 1.000000e+00 : f32
    %19 = vector.broadcast %cst : f32 to vector<64x1xf32>
    %20 = vector.broadcast %cst_4 : f32 to vector<64x1xf32>
    %21 = arith.select %18, %19, %20 : vector<64x1xi1>, vector<64x1xf32>
    %c7_i32 = arith.constant 7 : i32
    %22 = vector.broadcast %c7_i32 : i32 to vector<64x1xi32>
    %23 = arith.cmpi eq, %16, %22 : vector<64x1xi32>
    %cst_5 = arith.constant 0.000000e+00 : f32
    %cst_6 = arith.constant 1.000000e+00 : f32
    %24 = vector.broadcast %cst_5 : f32 to vector<64x1xf32>
    %25 = vector.broadcast %cst_6 : f32 to vector<64x1xf32>
    %26 = arith.select %23, %24, %25 : vector<64x1xi1>, vector<64x1xf32>
    %c0 = arith.constant 0 : index
    %c0_7 = arith.constant 0 : index
    %27 = vector.load %arg0[%c0, %c0_7] : memref<64x24xf32, #tpu.memory_space<vmem>>, vector<64x24xf32>
    %c0_8 = arith.constant 0 : index
    %c0_9 = arith.constant 0 : index
    %28 = vector.load %arg2[%c0_8, %c0_9] : memref<200x64xf32, #tpu.memory_space<vmem>>, vector<24x64xf32>
    %cst_10 = arith.constant dense<0.000000e+00> : vector<64x64xf32>
    %29 = tpu.matmul %27, %28, %cst_10 {dimension_numbers = #tpu.dot_dimension_numbers<[1], [0], [0], [1], [0, 0, 1, 1], [], []>} : vector<64x24xf32>, vector<24x64xf32>, vector<64x64xf32> -> vector<64x64xf32>
    %c24 = arith.constant 24 : index
    %c0_11 = arith.constant 0 : index
    %30 = vector.load %arg2[%c24, %c0_11] : memref<200x64xf32, #tpu.memory_space<vmem>>, vector<1x64xf32>
    %31 = vector.broadcast %30 : vector<1x64xf32> to vector<64x64xf32>
    %32 = arith.addf %29, %31 : vector<64x64xf32>
    %cst_12 = arith.constant 0.000000e+00 : f32
    %33 = vector.broadcast %cst_12 : f32 to vector<64x64xf32>
    %34 = arith.maximumf %32, %33 : vector<64x64xf32>
    %c63_i32 = arith.constant 63 : i32
    %35 = tpu.dynamic_rotate %34 by %c63_i32 dim 0 : vector<64x64xf32>, i32 -> vector<64x64xf32>
    %36 = vector.broadcast %26 : vector<64x1xf32> to vector<64x64xf32>
    %37 = arith.mulf %35, %36 : vector<64x64xf32>
    %38 = tpu.concatenate %34, %37 in 1 : vector<64x64xf32>, vector<64x64xf32> -> vector<64x128xf32>
    %c32 = arith.constant 32 : index
    %c0_13 = arith.constant 0 : index
    %39 = vector.load %arg2[%c32, %c0_13] : memref<200x64xf32, #tpu.memory_space<vmem>>, vector<128x64xf32>
    %cst_14 = arith.constant dense<0.000000e+00> : vector<64x64xf32>
    %40 = tpu.matmul %38, %39, %cst_14 {dimension_numbers = #tpu.dot_dimension_numbers<[1], [0], [0], [1], [0, 0, 1, 1], [], []>} : vector<64x128xf32>, vector<128x64xf32>, vector<64x64xf32> -> vector<64x64xf32>
    %c160 = arith.constant 160 : index
    %c0_15 = arith.constant 0 : index
    %41 = vector.load %arg2[%c160, %c0_15] : memref<200x64xf32, #tpu.memory_space<vmem>>, vector<1x64xf32>
    %42 = vector.broadcast %41 : vector<1x64xf32> to vector<64x64xf32>
    %43 = arith.addf %40, %42 : vector<64x64xf32>
    %cst_16 = arith.constant 0.000000e+00 : f32
    %44 = vector.broadcast %cst_16 : f32 to vector<64x64xf32>
    %45 = arith.maximumf %43, %44 : vector<64x64xf32>
    %c1_i32_17 = arith.constant 1 : i32
    %46 = tpu.dynamic_rotate %45 by %c1_i32_17 dim 0 : vector<64x64xf32>, i32 -> vector<64x64xf32>
    %47 = vector.broadcast %21 : vector<64x1xf32> to vector<64x64xf32>
    %48 = arith.mulf %46, %47 : vector<64x64xf32>
    %c63_i32_18 = arith.constant 63 : i32
    %49 = tpu.dynamic_rotate %45 by %c63_i32_18 dim 0 : vector<64x64xf32>, i32 -> vector<64x64xf32>
    %50 = vector.broadcast %26 : vector<64x1xf32> to vector<64x64xf32>
    %51 = arith.mulf %49, %50 : vector<64x64xf32>
    %52 = arith.maximumf %48, %45 : vector<64x64xf32>
    %53 = arith.maximumf %52, %51 : vector<64x64xf32>
    %c168 = arith.constant 168 : index
    %c0_19 = arith.constant 0 : index
    %54 = vector.load %arg2[%c168, %c0_19] : memref<200x64xf32, #tpu.memory_space<vmem>>, vector<32x64xf32>
    %cst_20 = arith.constant dense<0.000000e+00> : vector<32x64xf32>
    %55 = tpu.matmul %54, %53, %cst_20 {dimension_numbers = #tpu.dot_dimension_numbers<[1], [0], [0], [1], [0, 0, 1, 1], [], []>} : vector<32x64xf32>, vector<64x64xf32>, vector<32x64xf32> -> vector<32x64xf32>
    %56 = vector.extract_strided_slice %55 {offsets = [0, 0], sizes = [8, 64], strides = [1, 1]} : vector<32x64xf32> to vector<8x64xf32>
    %57 = vector.extract_strided_slice %55 {offsets = [8, 0], sizes = [8, 64], strides = [1, 1]} : vector<32x64xf32> to vector<8x64xf32>
    %58 = vector.extract_strided_slice %55 {offsets = [16, 0], sizes = [8, 64], strides = [1, 1]} : vector<32x64xf32> to vector<8x64xf32>
    %59 = vector.extract_strided_slice %55 {offsets = [24, 0], sizes = [8, 64], strides = [1, 1]} : vector<32x64xf32> to vector<8x64xf32>
    %60 = tpu.concatenate %56, %57, %58, %59 in 1 : vector<8x64xf32>, vector<8x64xf32>, vector<8x64xf32>, vector<8x64xf32> -> vector<8x256xf32>
    %c0_21 = arith.constant 0 : index
    %c0_22 = arith.constant 0 : index
    %61 = vector.load %arg4[%c0_21, %c0_22] : memref<336x32xf32, #tpu.memory_space<vmem>>, vector<256x32xf32>
    %cst_23 = arith.constant dense<0.000000e+00> : vector<8x32xf32>
    %62 = tpu.matmul %60, %61, %cst_23 {dimension_numbers = #tpu.dot_dimension_numbers<[1], [0], [0], [1], [0, 0, 1, 1], [], []>} : vector<8x256xf32>, vector<256x32xf32>, vector<8x32xf32> -> vector<8x32xf32>
    %c256 = arith.constant 256 : index
    %c0_24 = arith.constant 0 : index
    %63 = vector.load %arg4[%c256, %c0_24] : memref<336x32xf32, #tpu.memory_space<vmem>>, vector<1x32xf32>
    %64 = vector.broadcast %63 : vector<1x32xf32> to vector<8x32xf32>
    %65 = arith.addf %62, %64 : vector<8x32xf32>
    %cst_25 = arith.constant 0.000000e+00 : f32
    %66 = vector.broadcast %cst_25 : f32 to vector<8x32xf32>
    %67 = arith.maximumf %65, %66 : vector<8x32xf32>
    %c0_26 = arith.constant 0 : index
    %c0_27 = arith.constant 0 : index
    %68 = vector.load %arg1[%c0_26, %c0_27] : memref<8x96xf32, #tpu.memory_space<vmem>>, vector<8x64xf32>
    %c0_28 = arith.constant 0 : index
    %c0_29 = arith.constant 0 : index
    %69 = vector.load %arg3[%c0_28, %c0_29] : memref<72x128xf32, #tpu.memory_space<vmem>>, vector<64x128xf32>
    %cst_30 = arith.constant dense<0.000000e+00> : vector<8x128xf32>
    %70 = tpu.matmul %68, %69, %cst_30 {dimension_numbers = #tpu.dot_dimension_numbers<[1], [0], [0], [1], [0, 0, 1, 1], [], []>} : vector<8x64xf32>, vector<64x128xf32>, vector<8x128xf32> -> vector<8x128xf32>
    %c64 = arith.constant 64 : index
    %c0_31 = arith.constant 0 : index
    %71 = vector.load %arg3[%c64, %c0_31] : memref<72x128xf32, #tpu.memory_space<vmem>>, vector<1x128xf32>
    %72 = vector.broadcast %71 : vector<1x128xf32> to vector<8x128xf32>
    %73 = arith.addf %70, %72 : vector<8x128xf32>
    %c0_32 = arith.constant 0 : index
    %c64_33 = arith.constant 64 : index
    %74 = vector.load %arg1[%c0_32, %c64_33] : memref<8x96xf32, #tpu.memory_space<vmem>>, vector<8x32xf32>
    %75 = vector.extract_strided_slice %73 {offsets = [0, 0], sizes = [8, 32], strides = [1, 1]} : vector<8x128xf32> to vector<8x32xf32>
    %76 = arith.negf %75 : vector<8x32xf32>
    %77 = math.exp %76 : vector<8x32xf32>
    %cst_34 = arith.constant 1.000000e+00 : f32
    %78 = vector.broadcast %cst_34 : f32 to vector<8x32xf32>
    %79 = arith.addf %78, %77 : vector<8x32xf32>
    %80 = arith.divf %78, %79 : vector<8x32xf32>
    %81 = vector.extract_strided_slice %73 {offsets = [0, 32], sizes = [8, 32], strides = [1, 1]} : vector<8x128xf32> to vector<8x32xf32>
    %82 = arith.negf %81 : vector<8x32xf32>
    %83 = math.exp %82 : vector<8x32xf32>
    %cst_35 = arith.constant 1.000000e+00 : f32
    %84 = vector.broadcast %cst_35 : f32 to vector<8x32xf32>
    %85 = arith.addf %84, %83 : vector<8x32xf32>
    %86 = arith.divf %84, %85 : vector<8x32xf32>
    %87 = vector.extract_strided_slice %73 {offsets = [0, 64], sizes = [8, 32], strides = [1, 1]} : vector<8x128xf32> to vector<8x32xf32>
    %88 = math.tanh %87 : vector<8x32xf32>
    %89 = vector.extract_strided_slice %73 {offsets = [0, 96], sizes = [8, 32], strides = [1, 1]} : vector<8x128xf32> to vector<8x32xf32>
    %90 = arith.negf %89 : vector<8x32xf32>
    %91 = math.exp %90 : vector<8x32xf32>
    %cst_36 = arith.constant 1.000000e+00 : f32
    %92 = vector.broadcast %cst_36 : f32 to vector<8x32xf32>
    %93 = arith.addf %92, %91 : vector<8x32xf32>
    %94 = arith.divf %92, %93 : vector<8x32xf32>
    %95 = arith.mulf %86, %74 : vector<8x32xf32>
    %96 = arith.mulf %80, %88 : vector<8x32xf32>
    %97 = arith.addf %95, %96 : vector<8x32xf32>
    %98 = math.tanh %97 : vector<8x32xf32>
    %99 = arith.mulf %94, %98 : vector<8x32xf32>
    %c264 = arith.constant 264 : index
    %c0_37 = arith.constant 0 : index
    %100 = vector.load %arg4[%c264, %c0_37] : memref<336x32xf32, #tpu.memory_space<vmem>>, vector<64x8xf32>
    %c328 = arith.constant 328 : index
    %c0_38 = arith.constant 0 : index
    %101 = vector.load %arg4[%c328, %c0_38] : memref<336x32xf32, #tpu.memory_space<vmem>>, vector<1x8xf32>
    %102 = tpu.concatenate %67, %99 in 1 : vector<8x32xf32>, vector<8x32xf32> -> vector<8x64xf32>
    %cst_39 = arith.constant dense<0.000000e+00> : vector<8x8xf32>
    %103 = tpu.matmul %102, %100, %cst_39 {dimension_numbers = #tpu.dot_dimension_numbers<[1], [0], [0], [1], [0, 0, 1, 1], [], []>} : vector<8x64xf32>, vector<64x8xf32>, vector<8x8xf32> -> vector<8x8xf32>
    %104 = vector.broadcast %101 : vector<1x8xf32> to vector<8x8xf32>
    %105 = arith.addf %103, %104 : vector<8x8xf32>
    %cst_40 = arith.constant 0.000000e+00 : f32
    %106 = vector.broadcast %cst_40 : f32 to vector<8x8xf32>
    %107 = arith.maximumf %105, %106 : vector<8x8xf32>
    %cst_41 = arith.constant dense<0xFF800000> : vector<8xf32>
    %108 = vector.multi_reduction <maximumf>, %107, %cst_41 [1] : vector<8x8xf32> to vector<8xf32>
    %109 = vector.shape_cast %108 : vector<8xf32> to vector<8x1xf32>
    %110 = vector.broadcast %109 : vector<8x1xf32> to vector<8x8xf32>
    %111 = arith.subf %107, %110 : vector<8x8xf32>
    %112 = math.exp %111 : vector<8x8xf32>
    %cst_42 = arith.constant dense<0.000000e+00> : vector<8xf32>
    %113 = vector.multi_reduction <add>, %112, %cst_42 [1] : vector<8x8xf32> to vector<8xf32>
    %114 = vector.shape_cast %113 : vector<8xf32> to vector<8x1xf32>
    %115 = math.log %114 : vector<8x1xf32>
    %116 = vector.broadcast %115 : vector<8x1xf32> to vector<8x8xf32>
    %117 = arith.subf %111, %116 : vector<8x8xf32>
    %cst_43 = arith.constant 0.000000e+00 : f32
    %118 = vector.broadcast %cst_43 : f32 to vector<8x56xf32>
    %119 = tpu.concatenate %99, %97, %117, %118 in 1 : vector<8x32xf32>, vector<8x32xf32>, vector<8x8xf32>, vector<8x56xf32> -> vector<8x128xf32>
    %c0_44 = arith.constant 0 : index
    %c0_45 = arith.constant 0 : index
    %120 = vector.load %arg5[%c0_44, %c0_45] : memref<8x128xf32, #tpu.memory_space<vmem>>, vector<8x128xf32>
    tpu.vector_store %arg5[%c0_44, %c0_45], %119 {strides = array<i32>} : memref<8x128xf32, #tpu.memory_space<vmem>>, vector<8x128xf32>,
    return
  }
}

</mosaic_0001>

<bundles_post_ra>
// kernel: decoder_forward_pallas.1
= control target key start
LH: loop header
LB: loop body
LE: loop exit
PB: predicated region body
PF: predicated region fallthrough
CT: control target
= control target key end

     0   :  { %vm170_vm0 = vcmask 195584   ;;  %v20_v11 = vlaneseq  ;;  %v751_v24 = vmov 1.0   ;;  %vm301_vm10 = vcmask 523264   ;;  %s753_s30 = smov 96   ;;  %s1367_s2 = inlined_call_operand.vmem [shape: f32[200,64], index: 2, kind: input, shape index: {}]   ;;  %s1368_s0 = inlined_call_operand.vmem [shape: f32[64,24], index: 0, kind: input, shape index: {}]   ;;  %s1369_s4 = inlined_call_operand.vmem [shape: f32[336,32], index: 4, kind: input, shape index: {}]   ;;  %s1370_s3 = inlined_call_operand.vmem [shape: f32[72,128], index: 3, kind: input, shape index: {}]   ;;  %s1371_s1 = inlined_call_operand.vmem [shape: f32[8,96], index: 1, kind: input, shape index: {}]   ;;  %s1372_s5 = inlined_call_operand.vmem [shape: f32[8,128], index: 5, kind: output, shape index: {}]  }
   0x1   :  { %v167_v0 = vld [vmem:[%s1367_s2 + $0x10] sm:$0xff]  ;;  %v166_v1 = vld [vmem:[%s1367_s2 + $0x8] sm:$0xff]  ;;  %v165_v2 = vld [vmem:[%s1367_s2] sm:$0xff] }
   0x2   :  { %208 = vmatpush.msra.mxu0 %v167_v0  ;;  %v157_v3 = vld [vmem:[%s1368_s0] sm:$0xff]  ;;  %v158_v4 = vld [vmem:[%s1368_s0 + $0x8] sm:$0xff]  ;;  %v159_v5 = vld [vmem:[%s1368_s0 + $0x10] sm:$0xff]  ;;  %v831_v14 = vshrl.u32 %v20_v11, 7 }
   0x3   :  { %v160_v6 = vld [vmem:[%s1368_s0 + $0x18] sm:$0xff]  ;;  %v161_v7 = vld [vmem:[%s1368_s0 + $0x20] sm:$0xff]  ;;  %v162_v8 = vld [vmem:[%s1368_s0 + $0x28] sm:$0xff] }
   0x4   :  { %209 = vmatpush.msra.mxu0 %v166_v1  ;;  %v163_v9 = vld [vmem:[%s1368_s0 + $0x30] sm:$0xff]  ;;  %v164_v10 = vld [vmem:[%s1368_s0 + $0x38] sm:$0xff]  ;;  %v33_v16 = vand.u32 7, %v831_v14  ;;  %v844_v20 = vadd.s32 8, %v831_v14  ;;  %vm252_vm2 = vcmp.lt.s32.totalorder %v831_v14, 7  ;;  %s752_s0 = smov 64  }
   0x5   :  { %v829_v13 = vld [vmem:[%s1367_s2 + $0x18] ss:$0 sm:$0xff]  ;;  %v869_v31 = vadd.s32 16, %v831_v14  ;;  %v888_v40 = vadd.s32 24, %v831_v14  ;;  %v907_v49 = vadd.s32 32, %v831_v14  ;;  %v324_v51 = vld [vmem:[%s1367_s2 + $0x90] sm:$0xff] }
   0x6   :  { %210 = vmatpush.msra.mxu0 %v165_v2  ;;  %vm141_vm1 = vcmp.eq.s32.totalorder %v33_v16, 7  ;;  %v40_v26 = vand.u32 7, %v844_v20  ;;  %v325_v50 = vld [vmem:[%s1367_s2 + $0x98] sm:$0xff]  ;;  %v323_v53 = vld [vmem:[%s1367_s2 + $0x88] sm:$0xff]  ;;  %v322_v57 = vld [vmem:[%s1367_s2 + $0x80] sm:$0xff]  ;;  %v941_v63 = vadd.s32 40, %v831_v14 }
   0x7   :  { %715 = vmatmul.msk.f32.vlgmr.msra.gmra.mxu0 %vm170_vm0, %v157_v3  ;;  %v855_v25 = vsel %vm141_vm1, 0.0, %v751_v24  ;;  %v47_v35 = vand.u32 7, %v869_v31  ;;  %v54_v44 = vand.u32 7, %v888_v40  ;;  %328 = vmatpush.msra.mxu1 %v325_v50  ;;  %v61_v56 = vand.u32 7, %v907_v49  ;;  %v321_v61 = vld [vmem:[%s1367_s2 + $0x78] sm:$0xff]  ;;  %v320_v0 = vld [vmem:[%s1367_s2 + $0x70] sm:$0xff] }
   0x8   :  { %vm142_vm3 = vcmp.eq.s32.totalorder %v40_v26, 7  ;;  %v319_v2 = vld [vmem:[%s1367_s2 + $0x68] sm:$0xff]  ;;  %vm126_vm12 = vcmp.eq.s32.totalorder %v40_v26, 0  ;;  %vm385_vm13 = vcmp.lt.s32.totalorder %v831_v14, 1 }
   0x9   :  { %v875_v34 = vsel %vm142_vm3, 0.0, %v751_v24  ;;  %vm143_vm4 = vcmp.eq.s32.totalorder %v47_v35, 7  ;;  %vm144_vm5 = vcmp.eq.s32.totalorder %v54_v44, 7  ;;  %329 = vmatpush.msra.mxu1 %v324_v51  ;;  %vm145_vm6 = vcmp.eq.s32.totalorder %v61_v56, 7  ;;  %v312_v51 = vld [vmem:[%s1367_s2 + $0x30] sm:$0xff] }
   0xa   :  { %v894_v43 = vsel %vm143_vm4, 0.0, %v751_v24  ;;  %v922_v55 = vsel %vm144_vm5, 0.0, %v751_v24  ;;  %vm127_vm11 = vcmp.eq.s32.totalorder %v47_v35, 0  ;;  %vm128_vm14 = vcmp.eq.s32.totalorder %v54_v44, 0 }
   0xb   :  { %330 = vmatpush.msra.mxu1 %v323_v53  ;;  %v1067_v31 = vsel %vm127_vm11, 0.0, %v751_v24  ;;  %v1070_v20 = vsel %vm126_vm12, 0.0, %v751_v24  ;;  %vm1082_vm1 = vcmp.eq.s32.totalorder %v61_v56, 0  ;;  %vm1133_vm4 = vcmp.eq.s32.totalorder %v33_v16, 0 }
   0xc   :  { %vm708_vm11 = vcmask 588800  }
   0xd   :  { %331 = vmatpush.msra.mxu1 %v322_v57 }
   0xf   :  { %716 = vmatmul.msk.f32.gmra.mxu0 %vm170_vm0, %v158_v4  ;;  %332 = vmatpush.msra.mxu1 %v321_v61  ;;  %v953_v4 = vsel %vm145_vm6, 0.0, %v751_v24 }
  0x11   :  { %333 = vmatpush.msra.mxu1 %v320_v0 }
  0x13   :  { %334 = vmatpush.msra.mxu1 %v319_v2  ;;  %v310_v2 = vld [vmem:[%s1367_s2 + $0x20] sm:$0xff] }
  0x17   :  { %717 = vmatmul.msk.f32.gmra.mxu0 %vm170_vm0, %v159_v5  ;;  %v68_v5 = vand.u32 7, %v941_v63 }
  0x19   :  { %vm146_vm7 = vcmp.eq.s32.totalorder %v68_v5, 7  ;;  %vm130_vm3 = vcmp.eq.s32.totalorder %v68_v5, 0 }
  0x1f   :  { %718 = vmatmul.msk.f32.gmra.mxu0 %vm170_vm0, %v160_v6  ;;  %v318_v6 = vld [vmem:[%s1367_s2 + $0x60] sm:$0xff] }
  0x20   :  { %335 = vmatpush.msra.mxu1 %v318_v6 }
  0x27   :  { %719 = vmatmul.msk.f32.gmra.mxu0 %vm170_vm0, %v161_v7 }
  0x2f   :  { %720 = vmatmul.msk.f32.gmra.mxu0 %vm170_vm0, %v162_v8 }
  0x37   :  { %721 = vmatmul.msk.f32.gmra.mxu0 %vm170_vm0, %v163_v9 }
  0x3f   :  { %722 = vmatmul.msk.f32.gmra.mxu0 %vm170_vm0, %v164_v10  ;;  %v317_v10 = vld [vmem:[%s1367_s2 + $0x58] sm:$0xff] }
  0x40   :  { %336 = vmatpush.msra.mxu1 %v317_v10 }
  0x84   :  { %v212_v12 = vpop.f32.mrf.mxu0 }
  0x85   :  { %v834_v15 = vadd.f32 %v829_v13, %v212_v12  ;;  %v972_v12 = vadd.s32 56, %v831_v14 }
  0x87   :  { %v236_v18 = vmax.f32 %v834_v15, 0.0 }
  0x89   :  { %v850_v22 = vrot.slane %v236_v18, 1 }
  0x8c   :  { %v215_v17 = vpop.f32.mrf.mxu0 }
  0x8d   :  { %v839_v19 = vadd.f32 %v829_v13, %v215_v17  ;;  %v975_v17 = vadd.s32 48, %v831_v14  ;;  %v443_v14 = vld [vmem:[%s1367_s2 + $0xb0] sm:$0xff] }
  0x8f   :  { %v237_v21 = vmax.f32 %v839_v19, 0.0 }
  0x91   :  { %v245_v23 = vrot.slane %v237_v21, 1 }
  0x93   :  { %v259_v27 = vsel %vm252_vm2, %v850_v22, %v245_v23 }
  0x94   :  { %v218_v28 = vpop.f32.mrf.mxu0  ;;  %v261_v29 = vmul.f32 %v259_v27, %v855_v25 }
  0x95   :  { %v863_v30 = vadd.f32 %v829_v13, %v218_v28  ;;  %v315_v28 = vld [vmem:[%s1367_s2 + $0x48] sm:$0xff] }
  0x96   :  { %277 = vrot.lane.b32.xlu0 %v261_v29, %s752_s0 }
  0x97   :  { %v238_v32 = vmax.f32 %v863_v30, 0.0 }
  0x99   :  { %v246_v33 = vrot.slane %v238_v32, 1 }
  0x9b   :  { %v258_v36 = vsel %vm252_vm2, %v245_v23, %v246_v33  ;;  %v316_v23 = vld [vmem:[%s1367_s2 + $0x50] sm:$0xff] }
  0x9c   :  { %v221_v37 = vpop.f32.mrf.mxu0  ;;  %v262_v38 = vmul.f32 %v258_v36, %v875_v34  ;;  %337 = vmatpush.msra.mxu1 %v316_v23  ;;  %v82_v36 = vand.u32 7, %v972_v12 }
  0x9d   :  { %v882_v39 = vadd.f32 %v829_v13, %v221_v37  ;;  %v75_v37 = vand.u32 7, %v975_v17 }
  0x9e   :  { %279 = vrot.lane.b32.xlu0 %v262_v38, %s752_s0  ;;  %v314_v38 = vld [vmem:[%s1367_s2 + $0x40] sm:$0xff]  ;;  %338 = vmatpush.msra.mxu1 %v315_v28  ;;  %vm148_vm8 = vcmp.eq.s32.totalorder %v82_v36, 7  ;;  %vm132_vm15 = vcmp.eq.s32.totalorder %v82_v36, 0 }
  0x9f   :  { %v239_v41 = vmax.f32 %v882_v39, 0.0  ;;  %vm147_vm9 = vcmp.eq.s32.totalorder %v75_v37, 7  ;;  %v1011_v57 = vsel %vm148_vm8, 0.0, %v751_v24  ;;  %vm131_vm0 = vcmp.eq.s32.totalorder %v75_v37, 0 }
  0xa0   :  { %339 = vmatpush.msra.mxu1 %v314_v38  ;;  %v140_v49 = vsel %vm132_vm15, 0.0, %v751_v24  ;;  %v139_v56 = vsel %vm131_vm0, 0.0, %v751_v24  ;;  %vm659_vm8 = vcmask 261120  }
  0xa1   :  { %v247_v42 = vrot.slane %v239_v41, 1 }
  0xa3   :  { %v257_v45 = vsel %vm252_vm2, %v246_v33, %v247_v42  ;;  %v985_v33 = vsel %vm146_vm7, 0.0, %v751_v24 }
  0xa4   :  { %v224_v46 = vpop.f32.mrf.mxu0  ;;  %v263_v47 = vmul.f32 %v257_v45, %v894_v43 }
  0xa5   :  { %v901_v48 = vadd.f32 %v829_v13, %v224_v46 }
  0xa6   :  { %281 = vrot.lane.b32.xlu1 %v263_v47, %s752_s0  ;;  %v313_v47 = vld [vmem:[%s1367_s2 + $0x38] sm:$0xff] }
  0xa7   :  { %v240_v52 = vmax.f32 %v901_v48, 0.0  ;;  %340 = vmatpush.msra.mxu1 %v313_v47 }
  0xa9   :  { %v248_v54 = vrot.slane %v240_v52, 1  ;;  %341 = vmatpush.msra.mxu1 %v312_v51 }
  0xab   :  { %v256_v58 = vsel %vm252_vm2, %v247_v42, %v248_v54 }
  0xac   :  { %v227_v59 = vpop.f32.mrf.mxu0  ;;  %v264_v60 = vmul.f32 %v256_v58, %v922_v55  ;;  %v1014_v58 = vsel %vm147_vm9, 0.0, %v751_v24  ;;  %vm686_vm9 = vcmask 64512  }
  0xad   :  { %v935_v62 = vadd.f32 %v829_v13, %v227_v59 }
  0xae   :  { %283 = vrot.lane.b32.xlu1 %v264_v60, %s752_s0 }
  0xaf   :  { %v241_v1 = vmax.f32 %v935_v62, 0.0  ;;  %v735_v62 = vld [vmem:[%s1367_s2 + $0xa0] ss:$0 sm:$0xff] }
  0xb1   :  { %v249_v3 = vrot.slane %v241_v1, 1 }
  0xb3   :  { %v255_v7 = vsel %vm252_vm2, %v248_v54, %v249_v3  ;;  %v311_v54 = vld [vmem:[%s1367_s2 + $0x28] sm:$0xff] }
  0xb4   :  { %v230_v8 = vpop.f32.mrf.mxu0  ;;  %v265_v9 = vmul.f32 %v255_v7, %v953_v4  ;;  %342 = vmatpush.msra.mxu1 %v311_v54 }
  0xb5   :  { %v966_v11 = vadd.f32 %v829_v13, %v230_v8 }
  0xb6   :  { %285 = vrot.lane.b32.xlu2 %v265_v9, %s752_s0  ;;  %343 = vmatpush.msra.mxu1 %v310_v2 }
  0xb7   :  { %v242_v27 = vmax.f32 %v966_v11, 0.0 }
  0xb9   :  { %v250_v29 = vrot.slane %v242_v27, 1 }
  0xbb   :  { %v254_v42 = vsel %vm252_vm2, %v249_v3, %v250_v29 }
  0xbc   :  { %v233_v45 = vpop.f32.mrf.mxu0  ;;  %v266_v46 = vmul.f32 %v254_v42, %v985_v33 }
  0xbd   :  { %v234_v50 = vadd.f32 %v829_v13, %v233_v45 }
  0xbe   :  { %287 = vrot.lane.b32.xlu2 %v266_v46, %s752_s0 }
  0xbf   :  { %v243_v53 = vmax.f32 %v234_v50, 0.0 }
  0xc1   :  { %v251_v13 = vrot.slane %v243_v53, 1 }
  0xc3   :  { %v260_v59 = vsel %vm252_vm2, %v251_v13, %v850_v22  ;;  %v253_v60 = vsel %vm252_vm2, %v250_v29, %v251_v13 }
  0xc4   :  { %v268_v61 = vmul.f32 %v260_v59, %v1011_v57  ;;  %v267_v0 = vmul.f32 %v253_v60, %v1014_v58 }
  0xc6   :  { %291 = vrot.lane.b32.xlu1 %v268_v61, %s752_s0  ;;  %289 = vrot.lane.b32.xlu0 %v267_v0, %s752_s0  ;;  %v136_v0 = vsel %vm128_vm14, 0.0, %v751_v24 }
 0x108   :  { %v278_v3 = vpop.permute.xlu0 %277 }
 0x109   :  { %v302_v22 = vsel %vm301_vm10, %v236_v18, %v278_v3 }
 0x10a   :  { %344 = vmatmul.f32.vlgmr.msra.gmra.mxu1 %v302_v22 }
 0x110   :  { %v280_v6 = vpop.permute.xlu0 %279  ;;  %v286_v18 = vpop.permute.xlu2 %285 }
 0x111   :  { %v303_v7 = vsel %vm301_vm10, %v237_v21, %v280_v6  ;;  %v306_v19 = vsel %vm301_vm10, %v240_v52, %v286_v18 }
 0x112   :  { %347 = vmatmul.f32.gmra.mxu1 %v303_v7 }
 0x118   :  { %v282_v8 = vpop.permute.xlu1 %281  ;;  %v288_v21 = vpop.permute.xlu2 %287 }
 0x119   :  { %v304_v9 = vsel %vm301_vm10, %v238_v32, %v282_v8  ;;  %v307_v30 = vsel %vm301_vm10, %v241_v1, %v288_v21 }
 0x11a   :  { %350 = vmatmul.f32.gmra.mxu1 %v304_v9  ;;  %v138_v9 = vsel %vm130_vm3, 0.0, %v751_v24 }
 0x120   :  { %v284_v10 = vpop.permute.xlu1 %283 }
 0x121   :  { %v305_v15 = vsel %vm301_vm10, %v239_v41, %v284_v10 }
 0x122   :  { %353 = vmatmul.f32.gmra.mxu1 %v305_v15 }
 0x12a   :  { %356 = vmatmul.f32.gmra.mxu1 %v306_v19 }
 0x132   :  { %359 = vmatmul.f32.gmra.mxu1 %v307_v30 }
 0x138   :  { %v290_v32 = vpop.permute.xlu0 %289  ;;  %v292_v39 = vpop.permute.xlu1 %291 }
 0x139   :  { %v308_v11 = vsel %vm301_vm10, %v242_v27, %v290_v32  ;;  %v309_v41 = vsel %vm301_vm10, %v243_v53, %v292_v39 }
 0x13a   :  { %362 = vmatmul.f32.gmra.mxu1 %v308_v11  ;;  %v137_v11 = vsel %vm1082_vm1, 0.0, %v751_v24 }
 0x142   :  { %365 = vmatmul.f32.gmra.mxu1 %v309_v41 }
 0x187   :  { %v345_v23 = vpop.f32.mrf.mxu1 }
 0x188   :  { %v346_v45 = vadd.f32 %v735_v62, %v345_v23 }
 0x18a   :  { %v1057_v50 = vmax.f32 %v346_v45, 0.0  ;;  %v577_v45 = vld [vmem:[%s1370_s3 + $0x20] sm:$0xff] }
 0x18c   :  { %v402_v40 = vrot.slane %v1057_v50, 1  ;;  %v377_v8 = vrot.slane %v1057_v50, 7 }
 0x18f   :  { %v348_v28 = vpop.f32.mrf.mxu1 }
 0x190   :  { %v349_v53 = vadd.f32 %v735_v62, %v348_v28 }
 0x192   :  { %v1087_v2 = vmax.f32 %v349_v53, 0.0 }
 0x194   :  { %v378_v21 = vrot.slane %v1087_v2, 7 }
 0x196   :  { %v392_v16 = vsel %vm385_vm13, %v377_v8, %v378_v21 }
 0x197   :  { %v351_v48 = vpop.f32.mrf.mxu1 }
 0x198   :  { %v352_v13 = vadd.f32 %v735_v62, %v351_v48 }
 0x19a   :  { %v1092_v17 = vmax.f32 %v352_v13, 0.0 }
 0x19c   :  { %v379_v39 = vrot.slane %v1092_v17, 7 }
 0x19e   :  { %v391_v13 = vsel %vm385_vm13, %v378_v21, %v379_v39  ;;  %v505_v21 = vld [vmem:[%s1369_s4 + $0x40] sm:$0xff] }
 0x19f   :  { %v354_v29 = vpop.f32.mrf.mxu1 }
 0x1a0   :  { %v355_v51 = vadd.f32 %v735_v62, %v354_v29 }
 0x1a2   :  { %v1078_v44 = vmax.f32 %v355_v51, 0.0  ;;  %v404_v51 = vrot.slane %v1092_v17, 1 }
 0x1a4   :  { %v380_v63 = vrot.slane %v1078_v44, 7 }
 0x1a7   :  { %v357_v52 = vpop.f32.mrf.mxu1 }
 0x1a8   :  { %v358_v27 = vadd.f32 %v735_v62, %v357_v52 }
 0x1aa   :  { %v1064_v59 = vmax.f32 %v358_v27, 0.0 }
 0x1ac   :  { %v381_v37 = vrot.slane %v1064_v59, 7  ;;  %v406_v41 = vrot.slane %v1064_v59, 1 }
 0x1ae   :  { %v389_v28 = vsel %vm385_vm13, %v380_v63, %v381_v37 }
 0x1af   :  { %v360_v38 = vpop.f32.mrf.mxu1  ;;  %v398_v27 = vmul.f32 %v389_v28, %v137_v11  ;;  %v503_v11 = vld [vmem:[%s1369_s4 + $0x30] sm:$0xff] }
 0x1b0   :  { %v361_v46 = vadd.f32 %v735_v62, %v360_v38 }
 0x1b2   :  { %v1059_v54 = vmax.f32 %v361_v46, 0.0 }
 0x1b4   :  { %v382_v12 = vrot.slane %v1059_v54, 7  ;;  %v407_v5 = vrot.slane %v1059_v54, 1 }
 0x1b6   :  { %v388_v19 = vsel %vm385_vm13, %v381_v37, %v382_v12 }
 0x1b7   :  { %v363_v1 = vpop.f32.mrf.mxu1  ;;  %v399_v38 = vmul.f32 %v388_v19, %v138_v9  ;;  %v509_v9 = vld [vmem:[%s1369_s4 + $0x60] sm:$0xff]  ;;  %v506_v19 = vld [vmem:[%s1369_s4 + $0x48] sm:$0xff] }
 0x1b8   :  { %v364_v42 = vadd.f32 %v735_v62, %v363_v1  ;;  %v412_v1 = vsel %vm252_vm2, %v406_v41, %v407_v5 }
 0x1ba   :  { %v1051_v47 = vmax.f32 %v364_v42, 0.0  ;;  %v390_v42 = vsel %vm385_vm13, %v379_v39, %v380_v63  ;;  %v502_v39 = vld [vmem:[%s1369_s4 + $0x28] sm:$0xff] }
 0x1bc   :  { %v383_v26 = vrot.slane %v1051_v47, 7  ;;  %v408_v3 = vrot.slane %v1051_v47, 1 }
 0x1be   :  { %v387_v7 = vsel %vm385_vm13, %v382_v12, %v383_v26  ;;  %v411_v23 = vsel %vm252_vm2, %v407_v5, %v408_v3  ;;  %v133_v12 = vsel %vm1133_vm4, 0.0, %v751_v24 }
 0x1bf   :  { %v366_v60 = vpop.f32.mrf.mxu1  ;;  %v400_v32 = vmul.f32 %v387_v7, %v139_v56 }
 0x1c0   :  { %v367_v35 = vadd.f32 %v735_v62, %v366_v60  ;;  %v405_v62 = vrot.slane %v1078_v44, 1 }
 0x1c2   :  { %v376_v36 = vmax.f32 %v367_v35, 0.0  ;;  %v413_v53 = vsel %vm252_vm2, %v405_v62, %v406_v41  ;;  %v397_v35 = vmul.f32 %v390_v42, %v136_v0  ;;  %v414_v61 = vsel %vm252_vm2, %v404_v51, %v405_v62  ;;  %v501_v41 = vld [vmem:[%s1369_s4 + $0x20] sm:$0xff]  ;;  %v578_v42 = vld [vmem:[%s1370_s3 + $0x28] sm:$0xff] }
 0x1c3   :  { %v395_v0 = vmul.f32 %v392_v16, %v1070_v20  ;;  %v526_v16 = vld [vmem:[%s1369_s4 + $0xe8] sm:$0xff] }
 0x1c4   :  { %v384_v22 = vrot.slane %v376_v36, 7  ;;  %v409_v6 = vrot.slane %v376_v36, 1  ;;  %v429_v24 = vmax.f32 %v397_v35, %v1078_v44  ;;  %v522_v35 = vld [vmem:[%s1369_s4 + $0xc8] sm:$0xff] }
 0x1c6   :  { %v386_v10 = vsel %vm385_vm13, %v383_v26, %v384_v22  ;;  %v417_v15 = vsel %vm252_vm2, %v409_v6, %v402_v40  ;;  %v410_v18 = vsel %vm252_vm2, %v408_v3, %v409_v6  ;;  %v431_v26 = vmax.f32 %v399_v38, %v1059_v54  ;;  %v580_v38 = vld [vmem:[%s1370_s3 + $0x38] sm:$0xff] }
 0x1c7   :  { %v401_v30 = vmul.f32 %v386_v10, %v140_v49  ;;  %v425_v48 = vmul.f32 %v417_v15, %v1011_v57  ;;  %v424_v52 = vmul.f32 %v410_v18, %v1014_v58  ;;  %v432_v57 = vmax.f32 %v400_v32, %v1051_v47  ;;  %v508_v10 = vld [vmem:[%s1369_s4 + $0x58] sm:$0xff]  ;;  %v507_v18 = vld [vmem:[%s1369_s4 + $0x50] sm:$0xff] }
 0x1c8   :  { %v423_v58 = vmul.f32 %v411_v23, %v985_v33  ;;  %v422_v47 = vmul.f32 %v412_v1, %v953_v4  ;;  %v403_v33 = vrot.slane %v1087_v2, 1  ;;  %v430_v49 = vmax.f32 %v398_v27, %v1064_v59  ;;  %v500_v23 = vld [vmem:[%s1369_s4 + $0x18] sm:$0xff]  ;;  %v579_v1 = vld [vmem:[%s1370_s3 + $0x30] sm:$0xff]  ;;  %v574_v27 = vld [vmem:[%s1370_s3 + $0x8] sm:$0xff] }
 0x1c9   :  { %v433_v29 = vmax.f32 %v401_v30, %v376_v36  ;;  %v440_v60 = vmax.f32 %v432_v57, %v424_v52  ;;  %v393_v36 = vsel %vm385_vm13, %v384_v22, %v377_v8  ;;  %v421_v54 = vmul.f32 %v413_v53, %v922_v55  ;;  %v504_v30 = vld [vmem:[%s1369_s4 + $0x38] sm:$0xff]  ;;  %v497_v52 = vld [vmem:[%s1369_s4] sm:$0xff]  ;;  %v575_v57 = vld [vmem:[%s1370_s3 + $0x10] sm:$0xff] }
 0x1ca   :  { %v439_v37 = vmax.f32 %v431_v26, %v423_v58  ;;  %v396_v4 = vmul.f32 %v391_v13, %v1067_v31  ;;  %v415_v56 = vsel %vm252_vm2, %v403_v33, %v404_v51  ;;  %v438_v3 = vmax.f32 %v430_v49, %v422_v47  ;;  %v572_v58 = vld [vmem:[%s1371_s1] sm:$0xff]  ;;  %v528_v53 = vld [vmem:[%s1369_s4 + $0xf8] sm:$0xff]  ;;  %v527_v13 = vld [vmem:[%s1369_s4 + $0xf0] sm:$0xff] }
 0x1cb   :  { %v441_v46 = vmax.f32 %v433_v29, %v425_v48  ;;  %v420_v6 = vmul.f32 %v414_v61, %v894_v43  ;;  %v394_v22 = vmul.f32 %v393_v36, %v133_v12  ;;  %v437_v7 = vmax.f32 %v429_v24, %v421_v54  ;;  %v499_v48 = vld [vmem:[%s1369_s4 + $0x10] sm:$0xff]  ;;  %v498_v29 = vld [vmem:[%s1369_s4 + $0x8] sm:$0xff]  ;;  %v573_v51 = vld [vmem:[%s1370_s3] sm:$0xff] }
 0x1cc   :  { %v428_v59 = vmax.f32 %v396_v4, %v1092_v17  ;;  %v419_v55 = vmul.f32 %v415_v56, %v875_v34  ;;  %v416_v31 = vsel %vm252_vm2, %v402_v40, %v403_v33  ;;  %v427_v8 = vmax.f32 %v395_v0, %v1087_v2  ;;  %v442_v34 = vld [vmem:[%s1367_s2 + $0xa8] sm:$0xff]  ;;  %v512_v40 = vld [vmem:[%s1369_s4 + $0x78] sm:$0xff]  ;;  %v511_v2 = vld [vmem:[%s1369_s4 + $0x70] sm:$0xff] }
 0x1cd   :  { %466 = vmatpush.msra.mxu2 %v441_v46  ;;  %v426_v44 = vmax.f32 %v394_v22, %v1057_v50  ;;  %v418_v63 = vmul.f32 %v416_v31, %v855_v25  ;;  %v444_v50 = vld [vmem:[%s1367_s2 + $0xb8] sm:$0xff]  ;;  %v445_v25 = vld [vmem:[%s1367_s2 + $0xc0] sm:$0xff]  ;;  %531 = vmatpush.msra.mxu3 %v512_v40  ;;  %v510_v17 = vld [vmem:[%s1369_s4 + $0x68] sm:$0xff] }
 0x1ce   :  { %v436_v20 = vmax.f32 %v428_v59, %v420_v6  ;;  %v435_v43 = vmax.f32 %v427_v8, %v419_v55  ;;  %v576_v46 = vld [vmem:[%s1370_s3 + $0x18] sm:$0xff]  ;;  %v523_v47 = vld [vmem:[%s1369_s4 + $0xd0] sm:$0xff]  ;;  %v521_v33 = vld [vmem:[%s1369_s4 + $0xc0] sm:$0xff] }
 0x1cf   :  { %467 = vmatpush.msra.mxu2 %v440_v60  ;;  %v434_v5 = vmax.f32 %v426_v44, %v418_v63  ;;  %532 = vmatpush.msra.mxu3 %v511_v2  ;;  %v525_v60 = vld [vmem:[%s1369_s4 + $0xe0] sm:$0xff]  ;;  %v524_v26 = vld [vmem:[%s1369_s4 + $0xd8] sm:$0xff]  ;;  %v519_v12 = vld [vmem:[%s1369_s4 + $0xb0] sm:$0xff] }
 0x1d0   :  { %v520_v61 = vld [vmem:[%s1369_s4 + $0xb8] sm:$0xff]  ;;  %v518_v36 = vld [vmem:[%s1369_s4 + $0xa8] sm:$0xff]  ;;  %v515_v0 = vld [vmem:[%s1369_s4 + $0x90] sm:$0xff] }
 0x1d1   :  { %468 = vmatpush.msra.mxu2 %v439_v37  ;;  %533 = vmatpush.msra.mxu3 %v510_v17  ;;  %v517_v37 = vld [vmem:[%s1369_s4 + $0xa0] sm:$0xff]  ;;  %v516_v54 = vld [vmem:[%s1369_s4 + $0x98] sm:$0xff]  ;;  %v514_v56 = vld [vmem:[%s1369_s4 + $0x88] sm:$0xff] }
 0x1d3   :  { %469 = vmatpush.msra.mxu2 %v438_v3  ;;  %534 = vmatpush.msra.mxu3 %v509_v9  ;;  %v513_v3 = vld [vmem:[%s1369_s4 + $0x80] sm:$0xff] }
 0x1d5   :  { %470 = vmatpush.msra.mxu2 %v437_v7  ;;  %535 = vmatpush.msra.mxu3 %v508_v10  ;;  %v737_v7 = vld [vmem:[%s1370_s3 + $0x40] ss:$0 sm:$0xff]  ;;  %s754_s3 = smov 32  }
 0x1d7   :  { %471 = vmatpush.msra.mxu2 %v436_v20  ;;  %536 = vmatpush.msra.mxu3 %v507_v18 }
 0x1d9   :  { %472 = vmatpush.msra.mxu2 %v435_v43  ;;  %537 = vmatpush.msra.mxu3 %v506_v19 }
 0x1db   :  { %473 = vmatpush.msra.mxu2 %v434_v5  ;;  %538 = vmatpush.msra.mxu3 %v505_v21 }
 0x1dc   :  { %723 = vmatmul.msk.f32.vlgmr.msra.gmra.mxu2 %vm301_vm10, %v442_v34 }
 0x1dd   :  { %539 = vmatpush.msra.mxu3 %v504_v30  ;;  %551 = vmatpush.msrb.mxu2 %v528_v53 }
 0x1df   :  { %540 = vmatpush.msra.mxu3 %v503_v11  ;;  %552 = vmatpush.msrb.mxu2 %v527_v13  ;;  %v652_v11 = vld [vmem:[%s1369_s4 + $0x138] sm:$0xff] }
 0x1e1   :  { %541 = vmatpush.msra.mxu3 %v502_v39  ;;  %553 = vmatpush.msrb.mxu2 %v526_v16  ;;  %v651_v39 = vld [vmem:[%s1369_s4 + $0x130] sm:$0xff] }
 0x1e3   :  { %542 = vmatpush.msra.mxu3 %v501_v41  ;;  %554 = vmatpush.msrb.mxu2 %v525_v60  ;;  %v650_v41 = vld [vmem:[%s1369_s4 + $0x128] sm:$0xff] }
 0x1e4   :  { %724 = vmatmul.msk.f32.gmra.mxu2 %vm301_vm10, %v443_v14 }
 0x1e5   :  { %543 = vmatpush.msra.mxu3 %v500_v23  ;;  %555 = vmatpush.msrb.mxu2 %v524_v26  ;;  %v649_v23 = vld [vmem:[%s1369_s4 + $0x120] sm:$0xff] }
 0x1e7   :  { %544 = vmatpush.msra.mxu3 %v499_v48  ;;  %556 = vmatpush.msrb.mxu2 %v523_v47  ;;  %v647_v48 = vld [vmem:[%s1369_s4 + $0x110] sm:$0xff] }
 0x1e9   :  { %545 = vmatpush.msra.mxu3 %v498_v29  ;;  %557 = vmatpush.msrb.mxu2 %v522_v35 }
 0x1eb   :  { %546 = vmatpush.msra.mxu3 %v497_v52  ;;  %558 = vmatpush.msrb.mxu2 %v521_v33 }
 0x1ec   :  { %725 = vmatmul.msk.f32.gmra.mxu2 %vm301_vm10, %v444_v50 }
 0x1ed   :  { %594 = vmatpush.msrb.mxu3 %v580_v38  ;;  %559 = vmatpush.msrb.mxu2 %v520_v61  ;;  %v646_v38 = vld [vmem:[%s1369_s4 + $0x108] sm:$0xff] }
 0x1ef   :  { %595 = vmatpush.msrb.mxu3 %v579_v1  ;;  %560 = vmatpush.msrb.mxu2 %v519_v12 }
 0x1f1   :  { %596 = vmatpush.msrb.mxu3 %v578_v42  ;;  %561 = vmatpush.msrb.mxu2 %v518_v36 }
 0x1f3   :  { %597 = vmatpush.msrb.mxu3 %v577_v45  ;;  %562 = vmatpush.msrb.mxu2 %v517_v37 }
 0x1f4   :  { %726 = vmatmul.msk.f32.gmra.mxu2 %vm301_vm10, %v445_v25 }
 0x1f5   :  { %598 = vmatpush.msrb.mxu3 %v576_v46  ;;  %563 = vmatpush.msrb.mxu2 %v516_v54 }
 0x1f7   :  { %599 = vmatpush.msrb.mxu3 %v575_v57  ;;  %564 = vmatpush.msrb.mxu2 %v515_v0 }
 0x1f9   :  { %600 = vmatpush.msrb.mxu3 %v574_v27  ;;  %565 = vmatpush.msrb.mxu2 %v514_v56  ;;  %v738_v27 = vld [vmem:[%s1369_s4 + $0x148] ss:$0 sm:$0xff] }
 0x1fb   :  { %601 = vmatpush.msrb.mxu3 %v573_v51  ;;  %566 = vmatpush.msrb.mxu2 %v513_v3 }
 0x25f   :  { %v1204_v15 = vpop.f32.mrf.mxu2 }
 0x267   :  { %v478_v32 = vpop.f32.mrf.mxu2 }
 0x268   :  { %488 = vrot.lane.b32.xlu2 %v478_v32, %s752_s0  ;;  %v653_v32 = vld [vmem:[%s1369_s4 + $0x140] sm:$0xff] }
 0x269   :  { %673 = vmatpush.msra.mxu2 %v653_v32 }
 0x26b   :  { %674 = vmatpush.msra.mxu2 %v652_v11 }
 0x26d   :  { %675 = vmatpush.msra.mxu2 %v651_v39 }
 0x26f   :  { %v1231_v28 = vpop.f32.mrf.mxu2  ;;  %676 = vmatpush.msra.mxu2 %v650_v41 }
 0x270   :  { %626 = vrot.lane.b32.xlu2 %v572_v58, %s753_s30 }
 0x271   :  { %677 = vmatpush.msra.mxu2 %v649_v23 }
 0x277   :  { %v484_v62 = vpop.f32.mrf.mxu2 }
 0x278   :  { %492 = vrot.lane.b32.xlu0 %v484_v62, %s752_s0  ;;  %v736_v62 = vld [vmem:[%s1369_s4 + $0x100] ss:$0 sm:$0xff] }
 0x2c2   :  { %v489_v49 = vpop.permute.xlu2 %488 }
 0x2c3   :  { %v495_v4 = vsel %vm301_vm10, %v1204_v15, %v489_v49 }
 0x2c4   :  { %547 = vmatmul.f32.vlgmr.msra.gmra.mxu3 %v495_v4 }
 0x2ca   :  { %v627_v15 = vpop.permute.xlu2 %626 }
 0x2cc   :  { %727 = vmatmul.msk.f32.vlgmr.msrb.gmra.mxu3 %vm301_vm10, %v572_v58 }
 0x2ea   :  { %v493_v24 = vpop.permute.xlu0 %492 }
 0x2eb   :  { %v496_v6 = vsel %vm301_vm10, %v1231_v28, %v493_v24  ;;  %v648_v28 = vld [vmem:[%s1369_s4 + $0x118] sm:$0xff] }
 0x2ec   :  { %567 = vmatmul.f32.vlgmr.msrb.gmra.mxu2 %v496_v6 }
 0x2ed   :  { %678 = vmatpush.msra.mxu2 %v648_v28 }
 0x2ef   :  { %679 = vmatpush.msra.mxu2 %v647_v48 }
 0x2f1   :  { %680 = vmatpush.msra.mxu2 %v646_v38 }
 0x347   :  { %v548_v22 = vpop.f32.mrf.mxu3 }
 0x348   :  { %v549_v42 = vadd.f32 %v736_v62, %v548_v22 }
 0x34f   :  { %v603_v59 = vpop.f32.mrf.mxu3 }
 0x350   :  { %v604_v55 = vadd.f32 %v737_v7, %v603_v59 }
 0x352   :  { %739 = vtanh.f32 %v604_v55  ;;  %v728_v20 = vmul.f32 -1.442695, %v604_v55 }
 0x354   :  { %741 = vpow2.f32 %v728_v20 }
 0x358   :  { %v740_v31 = vpop.eup %739 }
 0x359   :  { %631 = vrot.lane.b32.xlu1 %v740_v31, %s752_s0 }
 0x35a   :  { %v742_v8 = vpop.eup %741 }
 0x35b   :  { %v609_v44 = vadd.f32 1.0, %v742_v8 }
 0x35d   :  { %743 = vrcp.f32 %v609_v44  ;;  %v621_v50 = vand.u32 2147483648, %v609_v44  ;;  %vm615_vm5 = vweird.f32 %v609_v44  ;;  %v619_v25 = vand.u32 2147483647, %v609_v44 }
 0x35f   :  { %v622_v2 = vor.u32 1.1754944e-38, %v621_v50  ;;  %vm620_vm7 = vcmp.eq.f32.partialorder %v619_v25, 8.507059e+37 }
 0x363   :  { %v744_v43 = vpop.eup %743 }
 0x364   :  { %v611_v63 = vmul.f32 %v744_v43, %v609_v44  ;;  %vm616_vm2 = vweird.f32 %v744_v43 }
 0x365   :  { %vm617_vm6 = vmor %vm615_vm5, %vm616_vm2 }
 0x366   :  { %v612_v5 = vsub.f32 1.0, %v611_v63 }
 0x368   :  { %v613_v34 = vmul.f32 %v744_v43, %v612_v5 }
 0x36a   :  { %v614_v14 = vadd.f32 %v744_v43, %v613_v34 }
 0x36c   :  { %v618_v40 = vsel %vm617_vm6, %v744_v43, %v614_v14 }
 0x36d   :  { %v623_v17 = vsel %vm620_vm7, %v622_v2, %v618_v40 }
 0x36e   :  { %v629_v18 = vmul.f32 %v627_v15, %v623_v17 }
 0x36f   :  { %v568_v1 = vpop.f32.mrf.mxu2 }
 0x370   :  { %v569_v45 = vadd.f32 %v568_v1, %v549_v42 }
 0x372   :  { %v571_v46 = vmax.f32 %v569_v45, 0.0 }
 0x3cb   :  { %v632_v9 = vpop.permute.xlu1 %631 }
 0x3cc   :  { %v634_v10 = vmul.f32 %v632_v9, %v623_v17 }
 0x3ce   :  { %636 = vrot.lane.b32.xlu0 %v634_v10, %s754_s3 }
 0x440   :  { %v637_v19 = vpop.permute.xlu0 %636 }
 0x441   :  { %v639_v21 = vadd.f32 %v637_v19, %v629_v18 }
 0x443   :  { %745 = vtanh.f32 %v639_v21 }
 0x449   :  { %v746_v30 = vpop.eup %745 }
 0x44a   :  { %642 = vrot.lane.b32.xlu1 %v746_v30, %s752_s0 }
 0x4bc   :  { %v643_v29 = vpop.permute.xlu1 %642 }
 0x4bd   :  { %v645_v52 = vmul.f32 %v643_v29, %v623_v17 }
 0x4bf   :  { %656 = vrot.lane.b32.xlu2 %v645_v52, %s752_s0 }
 0x4c7   :  { %699 = vrot.lane.b32.xlu2 %v645_v52, %s754_s3 }
 0x519   :  { %v657_v57 = vpop.permute.xlu2 %656 }
 0x51a   :  { %v660_v58 = vsel %vm659_vm8, %v571_v46, %v657_v57 }
 0x51b   :  { %729 = vmatmul.msk.f32.vlgmr.msra.gmra.mxu2 %vm301_vm10, %v660_v58 }
 0x521   :  { %v700_v49 = vpop.permute.xlu2 %699 }
 0x522   :  { %v706_v54 = vsel %vm659_vm8, %v700_v49, %v639_v21 }
 0x59e   :  { %v682_v51 = vpop.f32.mrf.mxu2 }
 0x59f   :  { %v683_v53 = vadd.f32 %v738_v27, %v682_v51 }
 0x5a1   :  { %v685_v13 = vmax.f32 %v683_v53, 0.0 }
 0x5a3   :  { %v687_v16 = vsel %vm686_vm9, %v685_v13, -inf }
 0x5a4   :  { %688 = vmax.xlane.f32.xlu0 %v687_v16 }
 0x617   :  { %v689_v60 = vpop.xlane.xlu0 %688 }
 0x618   :  { %v690_v26 = vsub.f32 %v685_v13, %v689_v60 }
 0x61a   :  { %v691_v47 = vmul.f32 1.442695, %v690_v26 }
 0x61c   :  { %747 = vpow2.f32 %v691_v47 }
 0x622   :  { %v748_v35 = vpop.eup %747 }
 0x623   :  { %v693_v33 = vsel %vm686_vm9, %v748_v35, 0.0 }
 0x624   :  { %694 = vadd.xlane.f32.xlu1 %v693_v33 }
 0x697   :  { %v695_v61 = vpop.xlane.xlu1 %694 }
 0x698   :  { %749 = vlog2.f32 %v695_v61 }
 0x69e   :  { %v750_v12 = vpop.eup %749 }
 0x69f   :  { %v697_v36 = vmul.f32 0.6931472, %v750_v12 }
 0x6a1   :  { %v698_v37 = vsub.f32 %v690_v26, %v697_v36 }
 0x6a3   :  { %703 = vrot.lane.b32.xlu2 %v698_v37, %s752_s0 }
 0x6fd   :  { %v704_v4 = vpop.permute.xlu2 %703 }
 0x6fe   :  { %v707_v0 = vsel %vm301_vm10, %v706_v54, %v704_v4 }
 0x6ff   :  { %v709_v56 = vsel %vm708_vm11, %v707_v0, 0.0 }
 0x700   :  { %710 = vst [vmem:[%s1372_s5] sm:$0xff] %v709_v56 }

</bundles_post_ra>
